<compile_context>
chip_gen: v5e
topology: v5e:2x2
jax: 0.10.0
libtpu: 0.0.40
codegen_flags: <defaults>
</compile_context>

<pallas_src>
import functools

import jax
import jax.numpy as jnp
from jax.experimental import pallas as pl
from jax.experimental.pallas import tpu as pltpu

_LANES = 128
_OUT_BLOCK = (8, 128)  # lane/sublane-aligned per-(batch, chunk) partial block


def _round_up(x, m):
    return ((x + m - 1) // m) * m


def _vmem_capacity_bytes():
    try:
        return int(pltpu.get_tpu_info().vmem_capacity_bytes)
    except Exception:
        return 64 << 20  # conservative fallback (v7x per-TensorCore VMEM)


def _choose_row_tile(rows, bytes_per_row, target_bytes):
    """Rows of 128 lanes per logits block.

    Use the full `rows` if one block fits the byte budget (the block's third
    dim then equals the array dim, so the multiple-of-8 rule does not apply).
    Otherwise use a balanced multiple-of-8 tile close to the budget, so the
    last tile is never mostly padding.  If the balanced tile count is odd,
    try one extra tile so the spatial axis can be split into two equal
    parallel chunks (v7x megacore) with no redundant reads.
    """
    tm_cap = max(8, (target_bytes // max(1, bytes_per_row)) // 8 * 8)
    if rows <= tm_cap:
        return rows
    num_tiles = pl.cdiv(rows, tm_cap)
    tm = _round_up(pl.cdiv(rows, num_tiles), 8)
    if pl.cdiv(rows, tm) % 2 == 1:
        tm_alt = _round_up(pl.cdiv(rows, pl.cdiv(rows, tm) + 1), 8)
        if pl.cdiv(rows, tm_alt) % 2 == 0:
            tm = tm_alt
    return tm


def _ce_kernel(x_ref, t_ref, out_ref, acc_ref, *, num_classes, tm,
               tiles_per_chunk, spatial, needs_mask):
    """One (tm, 128) slab of voxels for one (batch, spatial-chunk)."""
    s = pl.program_id(2)

    @pl.when(s == 0)
    def _():
        acc_ref[...] = jnp.zeros_like(acc_ref)

    t = t_ref[0, 0].astype(jnp.int32)                          # (tm, 128)
    # Cache the f32-converted class slabs (reused by max / exp / pick).
    xs = [x_ref[0, k].astype(jnp.float32) for k in range(num_classes)]

    # Class reduction as a compile-time unrolled loop over dense (tm, 128)
    # slabs: pure VALU max/add/select, no XLU sublane reduction, no iota
    # over the class axis.
    m = xs[0]
    for k in range(1, num_classes):
        m = jnp.maximum(m, xs[k])

    sum_exp = jnp.exp(xs[0] - m)
    picked = jnp.where(t == 0, xs[0], 0.0)
    for k in range(1, num_classes):
        sum_exp = sum_exp + jnp.exp(xs[k] - m)
        picked = picked + jnp.where(t == k, xs[k], 0.0)

    loss = m + jnp.log(sum_exp) - picked                       # (tm, 128)

    if needs_mask:
        # Zero contributions from wrapper padding / the partially-OOB last
        # row block.  Garbage (even NaN/Inf) stays confined to the masked
        # positions: every op above is per-(row,lane), and select does not
        # propagate values from the unselected branch.
        chunk = pl.program_id(1)
        row = jax.lax.broadcasted_iota(jnp.int32, (tm, _LANES), 0)
        lane = jax.lax.broadcasted_iota(jnp.int32, (tm, _LANES), 1)
        gidx = ((chunk * tiles_per_chunk + s) * tm + row) * _LANES + lane
        loss = jnp.where(gidx < spatial, loss, 0.0)

    acc_ref[...] += loss                       # VALU accumulate, no XLU/step

    @pl.when(s == pl.num_programs(2) - 1)
    def _():
        out_ref[...] = jnp.full(out_ref.shape, jnp.sum(acc_ref[...]),
                                dtype=out_ref.dtype)


def multiclass_entropy_loss_3d(logits, target, c=None, *, block_bytes=None):
    """Pallas equivalent of MulticlassEntropyLoss3D.forward(input, target, c).

    logits: (N, C, H, W, D) float (f32 or bf16); target: (N, 1, H, W, D)
    integer class ids.  Returns the scalar float32 mean cross-entropy.
    """
    n, ch = int(logits.shape[0]), int(logits.shape[1])
    if c is None:
        c = ch
    assert c == ch, "c must equal the channel dimension of `input`"
    assert int(target.shape[0]) == n and int(target.shape[1]) == 1

    spatial = 1
    for d in logits.shape[2:]:
        spatial *= int(d)

    # Keep targets <= 32-bit on the vector path (int64 would double target
    # HBM traffic); narrower int dtypes are accepted as-is and widened
    # in-kernel.  Float targets (PyTorch .long() semantics) are cast once.
    if (not jnp.issubdtype(target.dtype, jnp.integer)
            or jnp.dtype(target.dtype).itemsize > 4):
        target = target.astype(jnp.int32)  # rare slow path: one extra HBM pass

    # Per-generation block budget / explicit VMEM limit.
    vmem_cap = _vmem_capacity_bytes()
    big_vmem = vmem_cap >= (96 << 20)          # v5e / v6e: 128 MiB physical
    if block_bytes is None:
        block_bytes = (4 << 20) if big_vmem else (2 << 20)
    vmem_limit = (64 << 20) if big_vmem else (40 << 20)

    # Dense re-layout: (N, C, S) -> (N, C, rows, 128).  Metadata-only when
    # S % 128 == 0; otherwise pad the flattened spatial axis once and mask
    # the tail in-kernel.
    rows = pl.cdiv(spatial, _LANES)
    x3 = logits.reshape(n, ch, spatial)
    t3 = target.reshape(n, 1, spatial)
    pad = rows * _LANES - spatial
    if pad:
        # TODO(synk): the ragged-spatial path costs one extra HBM copy.
        x3 = jnp.pad(x3, ((0, 0), (0, 0), (0, pad)))
        t3 = jnp.pad(t3, ((0, 0), (0, 0), (0, pad)))
    x4 = x3.reshape(n, ch, rows, _LANES)
    t4 = t3.reshape(n, 1, rows, _LANES)

    bytes_per_row = ch * _LANES * jnp.dtype(logits.dtype).itemsize
    tm = _choose_row_tile(rows, bytes_per_row, block_bytes)
    num_tiles = pl.cdiv(rows, tm)

    # Two independent spatial chunks (second "parallel" grid axis) so v7x's
    # two TensorCores have work even when N == 1.  Only when the tile count
    # splits evenly, so single-TC chips never re-read tiles.
    n_chunks = 2 if (num_tiles >= 2 and num_tiles % 2 == 0) else 1
    tiles_per_chunk = num_tiles // n_chunks
    needs_mask = (n_chunks * tiles_per_chunk * tm * _LANES) != spatial

    def row_block(chunk, s):
        return chunk * tiles_per_chunk + s

    kernel = functools.partial(
        _ce_kernel, num_classes=ch, tm=tm, tiles_per_chunk=tiles_per_chunk,
        spatial=spatial, needs_mask=needs_mask)

    partials = pl.pallas_call(
        kernel,
        out_shape=jax.ShapeDtypeStruct((n, n_chunks) + _OUT_BLOCK, jnp.float32),
        grid_spec=pltpu.PrefetchScalarGridSpec(
            num_scalar_prefetch=0,
            grid=(n, n_chunks, tiles_per_chunk),
            in_specs=[
                pl.BlockSpec((1, ch, tm, _LANES),
                             lambda i, cc, s: (i, 0, row_block(cc, s), 0)),
                pl.BlockSpec((1, 1, tm, _LANES),
                             lambda i, cc, s: (i, 0, row_block(cc, s), 0)),
            ],
            out_specs=pl.BlockSpec((1, 1) + _OUT_BLOCK,
                                   lambda i, cc, s: (i, cc, 0, 0)),
            scratch_shapes=[pltpu.VMEM((tm, _LANES), jnp.float32)],
        ),
        compiler_params=pltpu.CompilerParams(
            dimension_semantics=("parallel", "parallel", "arbitrary"),
            vmem_limit_bytes=vmem_limit,
        ),
    )(x4, t4)

    total = jnp.sum(partials[:, :, 0, 0])
    # Mean over all N*H*W*D voxels (CrossEntropyLoss default 'mean').
    return total / jnp.float32(n * spatial)


def _reference(logits, target, c):
    """Pure-JAX reference matching the PyTorch module."""
    xf = jnp.moveaxis(logits, 1, -1).reshape(-1, c).astype(jnp.float32)
    tf = target.reshape(-1).astype(jnp.int32)
    lse = jax.scipy.special.logsumexp(xf, axis=-1)
    picked = jnp.take_along_axis(xf, tf[:, None], axis=-1)[:, 0]
    return jnp.mean(lse - picked)


def _check(shape_nchwd, dtype, block_bytes, key, rtol, atol):
    n, ccls, h, w, d = shape_nchwd
    k1, k2 = jax.random.split(key)
    logits = jax.random.normal(k1, (n, ccls, h, w, d),
                               dtype=jnp.float32).astype(dtype)
    target = jax.random.randint(k2, (n, 1, h, w, d), 0, ccls, dtype=jnp.int32)
    got = multiclass_entropy_loss_3d(logits, target, ccls,
                                     block_bytes=block_bytes)
    jax.block_until_ready(got)
    want = _reference(logits, target, ccls)
    assert jnp.allclose(got, want, rtol=rtol, atol=atol), (shape_nchwd, got, want)
    return got


if __name__ == "__main__":
    keys = jax.random.split(jax.random.PRNGKey(0), 4)

    # Main case: NCHWD = (2, 4, 16, 16, 8); spatial is a multiple of 128.
    _check((2, 4, 16, 16, 8), jnp.float32, None, keys[0], 1e-4, 1e-5)
    # Ragged spatial: wrapper pad + in-kernel mask, single full-dim row tile.
    _check((1, 3, 7, 9, 5), jnp.float32, None, keys[1], 1e-4, 1e-5)
    # Forced tiny blocks: multi-tile spatial reduction split into 2 chunks.
    _check((2, 5, 16, 16, 8), jnp.float32, 8192, keys[2], 1e-4, 1e-5)
    # bf16 logits, partially out-of-bounds last row block (masked in-kernel).
    _check((1, 2, 16, 16, 9), jnp.bfloat16, 8192, keys[3], 1e-3, 1e-3)

    print("KERNEL_OK")
</pallas_src>

<mosaic_0001>
module attributes {stable_mosaic.version = 11 : i64} {
  func.func @_ce_kernel(%arg0: i32, %arg1: i32, %arg2: i32, %arg3: memref<1x4x16x128xf32, #tpu.memory_space<vmem>>, %arg4: memref<1x1x16x128xi32, #tpu.memory_space<vmem>>, %arg5: memref<1x1x8x128xf32, #tpu.memory_space<vmem>>, %arg6: memref<16x128xf32, #tpu.memory_space<vmem>>) attributes {dimension_semantics = [#tpu.dimension_semantics<parallel>, #tpu.dimension_semantics<parallel>, #tpu.dimension_semantics<arbitrary>], iteration_bounds = array<i64: 2, 1, 1>, scalar_prefetch = 0 : i64, scratch_operands = 1 : i64, tpu.core_type = #tpu.core_type<tc>, window_params = [{transform_indices = @transform_0, window_bounds = array<i64: 1, 4, 16, 128>}, {transform_indices = @transform_1, window_bounds = array<i64: 1, 1, 16, 128>}, {transform_indices = @transform_2, window_bounds = array<i64: 1, 1, 8, 128>}]} {
    %c0_i32 = arith.constant 0 : i32
    %0 = arith.cmpi eq, %arg2, %c0_i32 : i32
    %1 = arith.extui %0 : i1 to i32
    %c0_i32_0 = arith.constant 0 : i32
    %2 = arith.cmpi ne, %1, %c0_i32_0 : i32
    scf.if %2 {
      %cst_27 = arith.constant 0.000000e+00 : f32
      %55 = vector.broadcast %cst_27 : f32 to vector<16x128xf32>
      %c0_28 = arith.constant 0 : index
      %c0_29 = arith.constant 0 : index
      %56 = vector.load %arg6[%c0_28, %c0_29] : memref<16x128xf32, #tpu.memory_space<vmem>>, vector<16x128xf32>
      tpu.vector_store %arg6[%c0_28, %c0_29], %55 {strides = array<i32>} : memref<16x128xf32, #tpu.memory_space<vmem>>, vector<16x128xf32>,
    } else {
    }
    %c0 = arith.constant 0 : index
    %c0_1 = arith.constant 0 : index
    %c0_2 = arith.constant 0 : index
    %c0_3 = arith.constant 0 : index
    %3 = vector.load %arg4[%c0, %c0_1, %c0_2, %c0_3] : memref<1x1x16x128xi32, #tpu.memory_space<vmem>>, vector<1x1x16x128xi32>
    %4 = vector.shape_cast %3 : vector<1x1x16x128xi32> to vector<16x128xi32>
    %c0_4 = arith.constant 0 : index
    %c0_5 = arith.constant 0 : index
    %c0_6 = arith.constant 0 : index
    %c0_7 = arith.constant 0 : index
    %5 = vector.load %arg3[%c0_4, %c0_5, %c0_6, %c0_7] : memref<1x4x16x128xf32, #tpu.memory_space<vmem>>, vector<1x1x16x128xf32>
    %6 = vector.shape_cast %5 : vector<1x1x16x128xf32> to vector<16x128xf32>
    %c0_8 = arith.constant 0 : index
    %c1 = arith.constant 1 : index
    %c0_9 = arith.constant 0 : index
    %c0_10 = arith.constant 0 : index
    %7 = vector.load %arg3[%c0_8, %c1, %c0_9, %c0_10] : memref<1x4x16x128xf32, #tpu.memory_space<vmem>>, vector<1x1x16x128xf32>
    %8 = vector.shape_cast %7 : vector<1x1x16x128xf32> to vector<16x128xf32>
    %c0_11 = arith.constant 0 : index
    %c2 = arith.constant 2 : index
    %c0_12 = arith.constant 0 : index
    %c0_13 = arith.constant 0 : index
    %9 = vector.load %arg3[%c0_11, %c2, %c0_12, %c0_13] : memref<1x4x16x128xf32, #tpu.memory_space<vmem>>, vector<1x1x16x128xf32>
    %10 = vector.shape_cast %9 : vector<1x1x16x128xf32> to vector<16x128xf32>
    %c0_14 = arith.constant 0 : index
    %c3 = arith.constant 3 : index
    %c0_15 = arith.constant 0 : index
    %c0_16 = arith.constant 0 : index
    %11 = vector.load %arg3[%c0_14, %c3, %c0_15, %c0_16] : memref<1x4x16x128xf32, #tpu.memory_space<vmem>>, vector<1x1x16x128xf32>
    %12 = vector.shape_cast %11 : vector<1x1x16x128xf32> to vector<16x128xf32>
    %13 = arith.maximumf %6, %8 : vector<16x128xf32>
    %14 = arith.maximumf %13, %10 : vector<16x128xf32>
    %15 = arith.maximumf %14, %12 : vector<16x128xf32>
    %16 = arith.subf %6, %15 : vector<16x128xf32>
    %17 = math.exp %16 : vector<16x128xf32>
    %c0_i32_17 = arith.constant 0 : i32
    %18 = vector.broadcast %c0_i32_17 : i32 to vector<16x128xi32>
    %19 = arith.cmpi eq, %4, %18 : vector<16x128xi32>
    %cst = arith.constant 0.000000e+00 : f32
    %20 = vector.broadcast %cst : f32 to vector<16x128xf32>
    %21 = arith.select %19, %6, %20 : vector<16x128xi1>, vector<16x128xf32>
    %22 = arith.subf %8, %15 : vector<16x128xf32>
    %23 = math.exp %22 : vector<16x128xf32>
    %24 = arith.addf %17, %23 : vector<16x128xf32>
    %c1_i32 = arith.constant 1 : i32
    %25 = vector.broadcast %c1_i32 : i32 to vector<16x128xi32>
    %26 = arith.cmpi eq, %4, %25 : vector<16x128xi32>
    %cst_18 = arith.constant 0.000000e+00 : f32
    %27 = vector.broadcast %cst_18 : f32 to vector<16x128xf32>
    %28 = arith.select %26, %8, %27 : vector<16x128xi1>, vector<16x128xf32>
    %29 = arith.addf %21, %28 : vector<16x128xf32>
    %30 = arith.subf %10, %15 : vector<16x128xf32>
    %31 = math.exp %30 : vector<16x128xf32>
    %32 = arith.addf %24, %31 : vector<16x128xf32>
    %c2_i32 = arith.constant 2 : i32
    %33 = vector.broadcast %c2_i32 : i32 to vector<16x128xi32>
    %34 = arith.cmpi eq, %4, %33 : vector<16x128xi32>
    %cst_19 = arith.constant 0.000000e+00 : f32
    %35 = vector.broadcast %cst_19 : f32 to vector<16x128xf32>
    %36 = arith.select %34, %10, %35 : vector<16x128xi1>, vector<16x128xf32>
    %37 = arith.addf %29, %36 : vector<16x128xf32>
    %38 = arith.subf %12, %15 : vector<16x128xf32>
    %39 = math.exp %38 : vector<16x128xf32>
    %40 = arith.addf %32, %39 : vector<16x128xf32>
    %c3_i32 = arith.constant 3 : i32
    %41 = vector.broadcast %c3_i32 : i32 to vector<16x128xi32>
    %42 = arith.cmpi eq, %4, %41 : vector<16x128xi32>
    %cst_20 = arith.constant 0.000000e+00 : f32
    %43 = vector.broadcast %cst_20 : f32 to vector<16x128xf32>
    %44 = arith.select %42, %12, %43 : vector<16x128xi1>, vector<16x128xf32>
    %45 = arith.addf %37, %44 : vector<16x128xf32>
    %46 = math.log %40 : vector<16x128xf32>
    %47 = arith.addf %15, %46 : vector<16x128xf32>
    %48 = arith.subf %47, %45 : vector<16x128xf32>
    %c0_21 = arith.constant 0 : index
    %c0_22 = arith.constant 0 : index
    %49 = vector.load %arg6[%c0_21, %c0_22] : memref<16x128xf32, #tpu.memory_space<vmem>>, vector<16x128xf32>
    %50 = arith.addf %49, %48 : vector<16x128xf32>
    %c0_23 = arith.constant 0 : index
    %c0_24 = arith.constant 0 : index
    %51 = vector.load %arg6[%c0_23, %c0_24] : memref<16x128xf32, #tpu.memory_space<vmem>>, vector<16x128xf32>
    tpu.vector_store %arg6[%c0_23, %c0_24], %50 {strides = array<i32>} : memref<16x128xf32, #tpu.memory_space<vmem>>, vector<16x128xf32>,
    %c0_i32_25 = arith.constant 0 : i32
    %52 = arith.cmpi eq, %arg2, %c0_i32_25 : i32
    %53 = arith.extui %52 : i1 to i32
    %c0_i32_26 = arith.constant 0 : i32
    %54 = arith.cmpi ne, %53, %c0_i32_26 : i32
    scf.if %54 {
      %c0_27 = arith.constant 0 : index
      %c0_28 = arith.constant 0 : index
      %55 = vector.load %arg6[%c0_27, %c0_28] : memref<16x128xf32, #tpu.memory_space<vmem>>, vector<16x128xf32>
      %56 = vector.shape_cast %55 : vector<16x128xf32> to vector<1x16x128xf32>
      %cst_29 = arith.constant dense<0.000000e+00> : vector<1xf32>
      %57 = vector.multi_reduction <add>, %56, %cst_29 [1, 2] : vector<1x16x128xf32> to vector<1xf32>
      %58 = vector.shape_cast %57 : vector<1xf32> to vector<1x1x1xf32>
      %59 = vector.extract %58[0, 0, 0] : f32 from vector<1x1x1xf32>
      %60 = vector.broadcast %59 : f32 to vector<1x1x8x128xf32>
      %c0_30 = arith.constant 0 : index
      %c0_31 = arith.constant 0 : index
      %c0_32 = arith.constant 0 : index
      %c0_33 = arith.constant 0 : index
      %61 = vector.load %arg5[%c0_30, %c0_31, %c0_32, %c0_33] : memref<1x1x8x128xf32, #tpu.memory_space<vmem>>, vector<1x1x8x128xf32>
      tpu.vector_store %arg5[%c0_30, %c0_31, %c0_32, %c0_33], %60 {strides = array<i32>} : memref<1x1x8x128xf32, #tpu.memory_space<vmem>>, vector<1x1x8x128xf32>,
    } else {
    }
    return
  }
  func.func @transform_0(%arg0: i32, %arg1: i32, %arg2: i32) -> (i32, i32, i32, i32) {
    %c1_i32 = arith.constant 1 : i32
    %0 = arith.muli %arg1, %c1_i32 : i32
    %1 = arith.addi %0, %arg2 : i32
    %c0_i32 = arith.constant 0 : i32
    %c0_i32_0 = arith.constant 0 : i32
    %c0_i32_1 = arith.constant 0 : i32
    return %arg0, %c0_i32, %1, %c0_i32_0 : i32, i32, i32, i32
  }
  func.func @transform_1(%arg0: i32, %arg1: i32, %arg2: i32) -> (i32, i32, i32, i32) {
    %c1_i32 = arith.constant 1 : i32
    %0 = arith.muli %arg1, %c1_i32 : i32
    %1 = arith.addi %0, %arg2 : i32
    %c0_i32 = arith.constant 0 : i32
    %c0_i32_0 = arith.constant 0 : i32
    %c0_i32_1 = arith.constant 0 : i32
    return %arg0, %c0_i32, %1, %c0_i32_0 : i32, i32, i32, i32
  }
  func.func @transform_2(%arg0: i32, %arg1: i32, %arg2: i32) -> (i32, i32, i32, i32) {
    %c0_i32 = arith.constant 0 : i32
    %c0_i32_0 = arith.constant 0 : i32
    %c0_i32_1 = arith.constant 0 : i32
    return %arg0, %arg1, %c0_i32, %c0_i32_0 : i32, i32, i32, i32
  }
}

</mosaic_0001>

<bundles_post_ra>
// kernel: tpu_custom_call.1
= control target key start
LH: loop header
LB: loop body
LE: loop exit
PB: predicated region body
PF: predicated region fallthrough
CT: control target
= control target key end

     0   :  { %7 = vsyncpa [#allocation4], 0  ;;  %s943_s0 = inlined_call_operand.hbm [shape: f32[2,4,16,128], index: 0, kind: input, shape index: {}]   ;;  %s944_s1 = inlined_call_operand.hbm [shape: s32[2,1,16,128], index: 1, kind: input, shape index: {}]   ;;  %s945_s2 = inlined_call_operand.hbm [shape: f32[2,1,8,128], index: 2, kind: output, shape index: {}]  }
   0x1   :  { %9 = vsyncpa [#allocation4 + $0x1], 0 }
   0x2   :  { %10 = vsyncpa [#allocation7], 0 }
   0x3   :  { %12 = vsyncpa [#allocation7 + $0x1], 0 }
   0x4   :  { %13 = vsyncpa [#allocation5], 0 }
   0x5   :  { %15 = vsyncpa [#allocation5 + $0x1], 0  ;;  %s765_s9 = smov 0   ;;  %s767_s10 = smov 0  }
   0x6   :  { %s769_s11 = smov 0   ;;  %s771_s12 = smov 0  }
   0x7   :  { %s773_s13 = smov 0   ;;  %s775_s14 = smov 0  }
   0x8 LB: > { %s483_s15 = sadd.s32 4294967295, %s746_s14   ;;  %s484_s16 = sadd.s32 4294967294, %s746_s14   ;;  %s746_s14 = sphi %s775_s14, %s21_s14   ;;  %s742_s13 = sphi %s773_s13, %s955_s13   ;;  %s738_s12 = sphi %s771_s12, %s954_s12   ;;  %s734_s11 = sphi %s769_s11, %s953_s11   ;;  %s730_s10 = sphi %s767_s10, %s952_s10   ;;  %s726_s9 = sphi %s765_s9, %s951_s9  }
   0x9   : > { %s40_s17 = sadd.s32 1, %s742_s13  ;;  %s51_s18 = sadd.s32 1, %s734_s11 }
   0xa   : > { %p42_p0 = scmp.ge.s32.totalorder %s40_s17, 2  ;;  %p58_p1 = scmp.ne.s32.totalorder %s734_s11, %s730_s10 }
   0xb   : > { %p59_p2 = scmp.eq.s32.totalorder %s746_s14, 0  ;;  %p64_p3 = scmp.ne.s32.totalorder %s730_s10, %s726_s9 }
   0xc   : > { %s957_s17 = smov (%p42_p0, %s40_s17), 0  ;;  %p65_p5 = scmp.eq.s32.totalorder %s483_s15, 0 }
   0xd   : > { %p806_p4 = por %p59_p2, %p58_p1  ;;  %s46_s20 = ssub.s32 %s742_s13, %s957_s17 }
   0xe   : > { %p120_p6 = scmp.eq.s32.totalorder %s483_s15, 1  ;;  %p49_p7 = scmp.eq.s32.totalorder %s46_s20, 0 }
   0xf   : > { %p812_p8 = por %p65_p5, %p64_p3  ;;  %p126_p10 = scmp.eq.s32.totalorder %s484_s16, 1 }
  0x10   : > { %p816_p9 = por %p120_p6, %p58_p1  ;;  %p486_p12 = scmp.ge.s32.totalorder %s746_s14, 2 }
  0x11   : > { %s821_s23 = scalar_select %p49_p7, %s734_s11, %s51_s18  }
  0x12   : > { %p823_p11 = por %p126_p10, %p64_p3  ;;  %p528_p13 = scmp.lt.s32.totalorder %s746_s14, 2 }
  0x13   : > { %s830_s25 = sand.u32 1, %s734_s11   ;;  %s507_s27 = sshll.u32 %s742_s13, 6 }
  0x14   : > { %s487_s26 = sshll.u32 %s830_s25, 6  ;;  %s158_s30 = scalar_lea.hbm %s943_s0, %s507_s27 }
  0x15   : > { %s150_s3 = scalar_lea.vmem [#allocation3], %s487_s26  ;;  %s159_s5 = sshll.u32 %s158_s30, 4  ;;  %s160_s5 = int_to_ptr.hbm [resolvable:$true] %s159_s5 }
  0x16   : > { %s161_s4 = sshll.u32 %s150_s3, 4  ;;  %p839_p0 = pnand %p528_p13, %p806_p4  ;;  %s162_s4 = int_to_ptr.vmem [resolvable:$true] %s161_s4 }
  0x17   : > { %p493_p1 = scmp.ge.s32.totalorder %s746_s14, 1  ;;  %s147_s7 = scalar_lea.sflag [#allocation4], %s830_s25 }
  0x18   : > { %s748_s8 = smov 128   ;;  %s749_s15 = smov 8  }
  0x19   : > { %520 = dma.hbm_to_vmem [thread:$0]  (!%p839_p0), %s160_s5, 1024, %s162_s4, %s147_s7, %s748_s8, %s748_s8, %s749_s15  }
  0x1a   : > { %p194_p2 = scmp.lt.s32.totalorder %s746_s14, 3  ;;  %s490_s16 = sshll.u32 %s830_s25, 4 }
  0x1b   : > { %s508_s18 = sshll.u32 %s742_s13, 4  ;;  %s175_s27 = scalar_lea.vmem [#allocation6], %s490_s16 }
  0x1c   : > { %p195_p3 = pnand %p493_p1, %p194_p2  ;;  %s183_s19 = scalar_lea.hbm %s944_s1, %s508_s18 }
  0x1d   : > { %s186_s28 = sshll.u32 %s175_s27, 4  ;;  %s184_s29 = sshll.u32 %s183_s19, 4  ;;  %s187_s28 = int_to_ptr.vmem [resolvable:$true] %s186_s28  ;;  %s185_s29 = int_to_ptr.hbm [resolvable:$true] %s184_s29 }
  0x1e   : > { %s172_s30 = scalar_lea.sflag [#allocation7], %s830_s25  ;;  %198 = sbr.rel (%p195_p3) target bundleno = 264 (0x108), region = 28 }
  0x1f   : > { %523 = dma.hbm_to_vmem [thread:$0]  (!%p839_p0), %s185_s29, 256, %s187_s28, %s172_s30, %s748_s8, %s748_s8, %s749_s15  }
  0x20   : > { %s857_s3 = sand.u32 (!%p195_p3), 1, %s730_s10  }
  0x21   : > { %s494_s4 = sshll.u32 (!%p195_p3), %s857_s3, 6  ;;  %s201_s5 = scalar_lea.sflag (!%p195_p3), [#allocation4], %s857_s3 }
  0x22   : > { %s204_s7 = scalar_lea.vmem (!%p195_p3), [#allocation3], %s494_s4 }
  0x23   : > { %713 = dma.done.wait (%p812_p8), %s201_s5, 1024  }
  0x24   : > { %715 = vsyncadd (%p812_p8), %s201_s5, 4294966272  ;;  %s495_s25 = sshll.u32 %s857_s3, 4  ;;  %s211_s6 = scalar_lea.sflag [#allocation7], %s857_s3 }
  0x25   : > { %s867_s8 = scalar_lea.vmem [#allocation6], %s495_s25 }
  0x26   : > { %717 = dma.done.wait (%p812_p8), %s211_s6, 256  }
  0x27   : > { %719 = vsyncadd (%p812_p8), %s211_s6, 4294967040  ;;  %v253_v0 = vld [vmem:[%s204_s7] sm:$0xff]  ;;  %v254_v1 = vld [vmem:[%s204_s7 + $0x8] sm:$0xff]  ;;  %s496_s21 = sshll.u32 %s857_s3, 3  ;;  %s504_s15 = sshll.u32 %s738_s12, 3 }
  0x28   : > { %v497_v2 = vld [vmem:[%s204_s7 + $0x10] sm:$0xff]  ;;  %v498_v3 = vld [vmem:[%s204_s7 + $0x18] sm:$0xff]  ;;  %v499_v4 = vld [vmem:[%s204_s7 + $0x20] sm:$0xff]  ;;  %s365_s20 = scalar_lea.hbm %s945_s2, %s504_s15  ;;  %s240_s26 = scalar_lea.vmem [#allocation8], %s496_s21 }
  0x29   : > { %v873_v5 = vld [vmem:[%s204_s7 + $0x28] sm:$0xff]  ;;  %v264_v6 = vmax.f32 %v253_v0, %v497_v2  ;;  %v265_v7 = vmax.f32 %v254_v1, %v498_v3  ;;  %v875_v8 = vld [vmem:[%s204_s7 + $0x30] sm:$0xff]  ;;  %v877_v9 = vld [vmem:[%s204_s7 + $0x38] sm:$0xff]  ;;  %s367_s19 = sshll.u32 %s240_s26, 4  ;;  %s369_s27 = sshll.u32 %s365_s20, 4  ;;  %s368_s19 = int_to_ptr.vmem [resolvable:$true] %s367_s19  ;;  %s370_s27 = int_to_ptr.hbm [resolvable:$true] %s369_s27 }
  0x2a   : > { %v251_v30 = vld [vmem:[%s867_s8] sm:$0xff]  ;;  %v252_v32 = vld [vmem:[%s867_s8 + $0x8] sm:$0xff]  ;;  %s354_s29 = scalar_lea.sflag [#allocation5], %s857_s3  ;;  %s674_s30 = sshra.s32 %s370_s27, 4  ;;  %s675_s30 = int_to_ptr.hbm [resolvable:$true] %s674_s30 }
  0x2b   : > { %v266_v10 = vmax.f32 %v264_v6, %v499_v4  ;;  %v267_v11 = vmax.f32 %v265_v7, %v873_v5  ;;  %vm276_vm0 = vcmp.eq.s32.totalorder %v251_v30, 0  ;;  %vm288_vm1 = vcmp.eq.s32.totalorder %v251_v30, 1  ;;  %s676_s4 = scalar_lea.hbm %s675_s30, 8  ;;  %s680_s7 = scalar_lea.hbm %s945_s2, 16 }
  0x2c   : > { %vm277_vm2 = vcmp.eq.s32.totalorder %v252_v32, 0  ;;  %vm289_vm3 = vcmp.eq.s32.totalorder %v252_v32, 1  ;;  %v278_v40 = vsel %vm276_vm0, %v253_v0, 0.0  ;;  %v290_v41 = vsel %vm288_vm1, %v497_v2, 0.0  ;;  %p677_p4 = scmp.ne.s32.totalorder %s675_s30, %s676_s4  ;;  %p681_p7 = scmp.lt.s32.totalorder %s675_s30, %s945_s2 }
  0x2d   : > { %v881_v12 = vmax.f32 %v266_v10, %v875_v8  ;;  %v884_v13 = vmax.f32 %v267_v11, %v877_v9  ;;  %v279_v44 = vsel %vm277_vm2, %v254_v1, 0.0  ;;  %v291_v45 = vsel %vm289_vm3, %v498_v3, 0.0  ;;  %p682_p8 = scmp.lt.s32.totalorder %s680_s7, %s676_s4 }
  0x2e   : > { %vm302_vm4 = vcmp.eq.s32.totalorder %v251_v30, 2  ;;  %vm303_vm5 = vcmp.eq.s32.totalorder %v252_v32, 2  ;;  %v292_v49 = vadd.f32 %v290_v41, %v278_v40  ;;  %v293_v51 = vadd.f32 %v291_v45, %v279_v44  ;;  %p678_p5 = pnand %p677_p4, %p816_p9 }
  0x2f   : > { %v270_v14 = vsub.f32 %v253_v0, %v881_v12  ;;  %v271_v15 = vsub.f32 %v254_v1, %v884_v13  ;;  %v280_v16 = vsub.f32 %v497_v2, %v881_v12  ;;  %v281_v17 = vsub.f32 %v498_v3, %v884_v13  ;;  %p683_p10 = por %p682_p8, %p681_p7 }
  0x30   : > { %v294_v18 = vsub.f32 %v499_v4, %v881_v12  ;;  %v295_v19 = vsub.f32 %v873_v5, %v884_v13  ;;  %v308_v23 = vsub.f32 %v875_v8, %v881_v12  ;;  %v309_v25 = vsub.f32 %v877_v9, %v884_v13  ;;  %p679_p6 = pneg %p678_p5 }
  0x31   : > { %v272_v20 = vmul.f32 1.442695, %v270_v14  ;;  %v274_v21 = vmul.f32 1.442695, %v271_v15  ;;  %v282_v22 = vmul.f32 1.442695, %v280_v16 }
  0x32   : > { %v284_v24 = vmul.f32 1.442695, %v281_v17  ;;  %v296_v26 = vmul.f32 1.442695, %v294_v18  ;;  %v298_v27 = vmul.f32 1.442695, %v295_v19  ;;  %p684_p13 = pnand %p683_p10, %p679_p6 }
  0x33   : > { %580 = vpow2.f32 %v272_v20  ;;  %v310_v28 = vmul.f32 1.442695, %v308_v23  ;;  %v312_v29 = vmul.f32 1.442695, %v309_v25  ;;  %v304_v52 = vsel %vm302_vm4, %v499_v4, 0.0 }
  0x34   : > { %582 = vpow2.f32 %v274_v21  ;;  %v305_v53 = vsel %vm303_vm5, %v873_v5, 0.0  ;;  %vm316_vm6 = vcmp.eq.s32.totalorder %v251_v30, 3  ;;  %vm317_vm7 = vcmp.eq.s32.totalorder %v252_v32, 3 }
  0x35   : > { %584 = vpow2.f32 %v282_v22  ;;  %v306_v54 = vadd.f32 %v304_v52, %v292_v49  ;;  %v307_v55 = vadd.f32 %v305_v53, %v293_v51  ;;  %v318_v56 = vsel %vm316_vm6, %v875_v8, 0.0 }
  0x36   : > { %586 = vpow2.f32 %v284_v24  ;;  %v319_v57 = vsel %vm317_vm7, %v877_v9, 0.0 }
  0x37   : > { %588 = vpow2.f32 %v296_v26  ;;  %v320_v60 = vadd.f32 %v318_v56, %v306_v54  ;;  %v321_v62 = vadd.f32 %v319_v57, %v307_v55 }
  0x38   : > { %590 = vpow2.f32 %v298_v27 }
  0x39   : > { %v581_v31 = vpop.eup %580  ;;  %592 = vpow2.f32 %v310_v28 }
  0x3a   : > { %v583_v33 = vpop.eup %582  ;;  %594 = vpow2.f32 %v312_v29 }
  0x3b   : > { %v585_v34 = vpop.eup %584 }
  0x3c   : > { %v587_v35 = vpop.eup %586  ;;  %v286_v36 = vadd.f32 %v585_v34, %v581_v31 }
  0x3d   : > { %v589_v37 = vpop.eup %588  ;;  %v287_v38 = vadd.f32 %v587_v35, %v583_v33 }
  0x3e   : > { %v591_v39 = vpop.eup %590  ;;  %v300_v42 = vadd.f32 %v589_v37, %v286_v36 }
  0x3f   : > { %v593_v43 = vpop.eup %592  ;;  %v301_v46 = vadd.f32 %v591_v39, %v287_v38 }
  0x40   : > { %v595_v47 = vpop.eup %594  ;;  %v314_v48 = vadd.f32 %v593_v43, %v300_v42 }
  0x41   : > { %v315_v50 = vadd.f32 %v595_v47, %v301_v46 }
  0x42   : > { %596 = vlog2.f32 %v314_v48 }
  0x43   : > { %598 = vlog2.f32 %v315_v50 }
  0x48   : > { %v597_v58 = vpop.eup %596 }
  0x49   : > { %v599_v59 = vpop.eup %598  ;;  %v323_v61 = vmul.f32 0.6931472, %v597_v58 }
  0x4a   : > { %v325_v63 = vmul.f32 0.6931472, %v599_v59 }
  0x4b   : > { %v326_v0 = vadd.f32 %v323_v61, %v881_v12 }
  0x4c   : > { %v327_v1 = vadd.f32 %v325_v63, %v884_v13 }
  0x4d   : > { %v328_v2 = vsub.f32 %v326_v0, %v320_v60 }
  0x4e   : > { %v329_v3 = vsub.f32 %v327_v1, %v321_v62 }
  0x50   : > { %v341_v4 = vadd.f32 %v329_v3, %v328_v2 }
  0x52   : > { %342 = vadd.xlane.f32.xlu0 %v341_v4 }
  0xc5   : > { %v343_v5 = vpop.xlane.xlu0 %342 }
  0xc6   : > { %v344_v6 = vrot.slane %v343_v5, 4 }
  0xc8   : > { %v345_v7 = vadd.f32 %v344_v6, %v343_v5 }
  0xca   : > { %v346_v8 = vrot.slane %v345_v7, 2 }
  0xcc   : > { %v347_v9 = vadd.f32 %v346_v8, %v345_v7 }
  0xce   : > { %v348_v10 = vrot.slane %v347_v9, 1 }
  0xd0   : > { %v349_v11 = vadd.f32 %v348_v10, %v347_v9 }
  0xd2   : > { %509 = vpush %v349_v11 }
 0x103   : > { %s510_s28 = spop %509 }
 0x104   : > { %v351_v12 = vstv %s510_s28 }
 0x105   : > { %352 = vst [vmem:[%s240_s26] sm:$0xff] %v351_v12 }
 0x106   : > { %687 = shalt.err (!%p684_p13)
}
 0x107   : > { %515 = dma.vmem_to_hbm [thread:$0]  (%p816_p9), %s368_s19, 128, %s370_s27, %s354_s29  }
 0x108 PF: > { %s381_s3 = sand.u32 1, %s726_s9   ;;  %p525_p0 = pnand %p486_p12, %p823_p11 }
 0x109   : > { %s382_s8 = scalar_lea.sflag [#allocation5], %s381_s3 }
 0x10a   : > { %p526_p1 = pneg %p525_p0 }
 0x10c   : > { %721 = dma.done.wait (%p526_p1), %s382_s8, 128  }
 0x10d   : > { %723 = vsyncadd (%p526_p1), %s382_s8, 4294967168  ;;  %s21_s14 = sadd.s32 1, %s746_s14   ;;  %s951_s9 = smov %s730_s10 }
 0x10e   : > { %p18_p2 = scmp.ge.s32.totalorder %s21_s14, 4   ;;  %s952_s10 = smov %s734_s11 }
 0x10f   : > { %s953_s11 = smov %s821_s23  ;;  %s954_s12 = smov %s742_s13 }
 0x110   : > { %s955_s13 = smov %s957_s17  ;;  %20 = sbr.rel (!%p18_p2) target bundleno = 8 (0x8), region = 97 }
 0x115   :  { %388 = vsyncpa [#allocation4], 1 }
 0x116   :  { %390 = vsyncpa [#allocation4 + $0x1], 1 }
 0x117   :  { %391 = vsyncpa [#allocation7], 1 }
 0x118   :  { %393 = vsyncpa [#allocation7 + $0x1], 1 }
 0x119   :  { %394 = vsyncpa [#allocation5], 1 }
 0x11a   :  { %396 = vsyncpa [#allocation5 + $0x1], 1 }

</bundles_post_ra>
